<compile_context>
chip_gen: v7x
topology: tpu7x:2x2x1
jax: 0.10.0
libtpu: 0.0.40
codegen_flags: <defaults>
</compile_context>

<pallas_src>
import jax
import jax.numpy as jnp
from jax import lax
from jax.experimental import pallas as pl
from jax.experimental.pallas import tpu as pltpu


def _round_up(x, m):
    return ((x + m - 1) // m) * m


def _pick_tiles(S, B, H, itemsize, budget_bytes=8 << 20):
    """Padding-/dtype-aware pick of the (ts, tb, H) encoder tile.

    VMEM tiles pad the last two dims to (sublane, 128) multiples, so the real
    per-S-row footprint is round_up(tb, sublane) * round_up(H, 128) * itemsize.
    """
    sublane = {4: 8, 2: 16, 1: 32}.get(itemsize, 8)
    lane_h = _round_up(H, 128)

    # Batch tile: keep a 'parallel' grid axis (megacore on v7x) but stay
    # sublane-aligned; tiny B uses the full dim (always a legal block dim).
    if B <= sublane:
        tb = B
    else:
        tb = sublane * max(1, min(B // sublane, 64 // sublane))

    row_bytes = _round_up(tb, sublane) * lane_h * itemsize
    ts = max(1, min(S, budget_bytes // max(row_bytes, 1)))
    return ts, tb


def _encoder_sum_over_seq(encoder_outputs):
    """Streaming sum of encoder_outputs (S, B, H) over S -> (B, H), in-kernel."""
    S, B, H = encoder_outputs.shape
    dtype = encoder_outputs.dtype
    itemsize = jnp.dtype(dtype).itemsize

    ts, tb = _pick_tiles(S, B, H, itemsize)
    nb, ns = pl.cdiv(B, tb), pl.cdiv(S, ts)
    needs_s_mask = (S % ts) != 0   # partial last S-block must not pollute the sum

    def kernel(enc_ref, ctx_ref, acc_ref):
        k = pl.program_id(1)

        @pl.when(k == 0)
        def _():
            acc_ref[...] = jnp.zeros_like(acc_ref)

        enc = enc_ref[...].astype(jnp.float32)            # (ts, tb, H)
        if needs_s_mask:
            s_idx = lax.broadcasted_iota(jnp.int32, enc.shape, 0) + k * ts
            enc = jnp.where(s_idx < S, enc, 0.0)
        acc_ref[...] += jnp.sum(enc, axis=0)              # f32 accumulation

        @pl.when(k == pl.num_programs(1) - 1)
        def _():
            ctx_ref[...] = acc_ref[...].astype(ctx_ref.dtype)

    bytes_accessed = S * B * H * itemsize + B * H * itemsize
    return pl.pallas_call(
        kernel,
        out_shape=jax.ShapeDtypeStruct((B, H), dtype),
        grid_spec=pltpu.PrefetchScalarGridSpec(
            num_scalar_prefetch=0,
            grid=(nb, ns),                                # batch parallel, S reduction last
            in_specs=[pl.BlockSpec((ts, tb, H), lambda i, k: (k, i, 0))],
            out_specs=pl.BlockSpec((tb, H), lambda i, k: (i, 0)),
            scratch_shapes=[pltpu.VMEM((tb, H), jnp.float32)],
        ),
        compiler_params=pltpu.CompilerParams(
            dimension_semantics=("parallel", "arbitrary"),
            vmem_limit_bytes=32 << 20,
        ),
        cost_estimate=pl.CostEstimate(
            flops=S * B * H, transcendentals=0, bytes_accessed=bytes_accessed),
    )(encoder_outputs)


def concatenate_attention(decoder_hidden, encoder_outputs, w_in, b_in, v_w):
    """decoder_hidden: (L, B, H); encoder_outputs: (S, B, H)."""
    S, B, H = encoder_outputs.shape

    # TODO(synk): the upstream module applies softmax over a size-1 dim (dim=2
    # of the (S, B, 1) v(energy) tensor), so the attention weights are exactly
    # 1.0 and the Linear(2H->H)+tanh+v path cannot affect the outputs.  We skip
    # that dead compute (bit-identical result).  If the softmax dim is ever
    # fixed to run over S, reinstate a batched (B*S, H) energy path on the MXU.
    assert v_w.shape[0] == 1, "v projects to 1 unit -> softmax dim is size-1"
    del decoder_hidden, w_in, b_in

    ctx = _encoder_sum_over_seq(encoder_outputs)          # (B, H)

    # Attention scores are a compile-time constant (all ones); emit in the
    # wrapper so the kernel keeps a single lane-dense output stream.
    attention_scores = jnp.ones((B, 1, S), dtype=encoder_outputs.dtype)

    # --- glue: match the torch output shapes exactly ---
    weighted_context = ctx.reshape(1, B, H)               # (1, B, H), metadata-only
    if weighted_context.shape[1] == 1:                    # torch .squeeze(1)
        weighted_context = jnp.squeeze(weighted_context, axis=1)
    return weighted_context, attention_scores


def _reference(decoder_hidden, encoder_outputs, w_in, b_in, v_w):
    """Full, unoptimized re-statement of the PyTorch forward (all params used)."""
    S, B, H = encoder_outputs.shape
    dec = decoder_hidden[-1]                                      # (B, H)
    dec_rep = jnp.transpose(
        jnp.broadcast_to(dec[:, None, :], (B, S, H)), (1, 0, 2))  # (S, B, H)
    combined = jnp.concatenate([encoder_outputs, dec_rep], axis=2)
    energy = jnp.tanh(combined @ w_in.T + b_in)                   # (S, B, H)
    att = jax.nn.softmax(energy @ v_w.T, axis=2)                  # (S, B, 1)
    att = jnp.transpose(jnp.transpose(att, (1, 0, 2)), (0, 2, 1))  # (B, 1, S)
    enc_b = jnp.transpose(encoder_outputs, (1, 0, 2))             # (B, S, H)
    wc = jnp.einsum('bos,bsh->boh', att, enc_b)                   # (B, 1, H)
    wc = jnp.transpose(wc, (1, 0, 2))                             # (1, B, H)
    if wc.shape[1] == 1:
        wc = jnp.squeeze(wc, axis=1)
    return wc, att


if __name__ == "__main__":
    S, B, H, L = 8, 2, 32, 2
    key = jax.random.PRNGKey(0)
    k1, k2, k3, k4, k5 = jax.random.split(key, 5)

    decoder_hidden = jax.random.normal(k1, (L, B, H), jnp.float32)
    encoder_outputs = jax.random.normal(k2, (S, B, H), jnp.float32)

    # nn.Linear-style deterministic init (uniform in +-1/sqrt(fan_in))
    bound_in = 1.0 / float(jnp.sqrt(2.0 * H))
    w_in = jax.random.uniform(k3, (H, 2 * H), jnp.float32, -bound_in, bound_in)
    b_in = jax.random.uniform(k4, (H,), jnp.float32, -bound_in, bound_in)
    bound_v = 1.0 / float(jnp.sqrt(1.0 * H))
    v_w = jax.random.uniform(k5, (1, H), jnp.float32, -bound_v, bound_v)

    wc, att = concatenate_attention(decoder_hidden, encoder_outputs,
                                    w_in, b_in, v_w)
    wc = jax.block_until_ready(wc)
    att = jax.block_until_ready(att)

    ref_wc, ref_att = _reference(decoder_hidden, encoder_outputs,
                                 w_in, b_in, v_w)
    assert wc.shape == ref_wc.shape and att.shape == ref_att.shape
    assert jnp.allclose(wc, ref_wc, atol=1e-4, rtol=1e-4), "context mismatch"
    assert jnp.allclose(att, ref_att, atol=1e-5, rtol=1e-5), "scores mismatch"

    print("KERNEL_OK")
</pallas_src>

<mosaic_0001>
module attributes {stable_mosaic.version = 11 : i64} {
  func.func @kernel(%arg0: i32, %arg1: i32, %arg2: memref<8x2x32xf32, #tpu.memory_space<vmem>>, %arg3: memref<2x32xf32, #tpu.memory_space<vmem>>, %arg4: memref<2x32xf32, #tpu.memory_space<vmem>>) attributes {dimension_semantics = [#tpu.dimension_semantics<parallel>, #tpu.dimension_semantics<arbitrary>], iteration_bounds = array<i64: 1, 1>, scalar_prefetch = 0 : i64, scratch_operands = 1 : i64, tpu.core_type = #tpu.core_type<tc>, window_params = [{transform_indices = @transform_0, window_bounds = array<i64: 8, 2, 32>}, {transform_indices = @transform_1, window_bounds = array<i64: 2, 32>}]} {
    %c0_i32 = arith.constant 0 : i32
    %0 = arith.cmpi eq, %arg1, %c0_i32 : i32
    %1 = arith.extui %0 : i1 to i32
    %c0_i32_0 = arith.constant 0 : i32
    %2 = arith.cmpi ne, %1, %c0_i32_0 : i32
    scf.if %2 {
      %cst_9 = arith.constant 0.000000e+00 : f32
      %11 = vector.broadcast %cst_9 : f32 to vector<2x32xf32>
      %c0_10 = arith.constant 0 : index
      %c0_11 = arith.constant 0 : index
      %12 = vector.load %arg4[%c0_10, %c0_11] : memref<2x32xf32, #tpu.memory_space<vmem>>, vector<2x32xf32>
      tpu.vector_store %arg4[%c0_10, %c0_11], %11 {strides = array<i32>} : memref<2x32xf32, #tpu.memory_space<vmem>>, vector<2x32xf32>,
    } else {
    }
    %c0 = arith.constant 0 : index
    %c0_1 = arith.constant 0 : index
    %c0_2 = arith.constant 0 : index
    %3 = vector.load %arg2[%c0, %c0_1, %c0_2] : memref<8x2x32xf32, #tpu.memory_space<vmem>>, vector<8x2x32xf32>
    %c0_3 = arith.constant 0 : index
    %c0_4 = arith.constant 0 : index
    %4 = vector.load %arg4[%c0_3, %c0_4] : memref<2x32xf32, #tpu.memory_space<vmem>>, vector<2x32xf32>
    %cst = arith.constant dense<0.000000e+00> : vector<2x32xf32>
    %5 = vector.multi_reduction <add>, %3, %cst [0] : vector<8x2x32xf32> to vector<2x32xf32>
    %6 = arith.addf %4, %5 : vector<2x32xf32>
    %c0_5 = arith.constant 0 : index
    %c0_6 = arith.constant 0 : index
    %7 = vector.load %arg4[%c0_5, %c0_6] : memref<2x32xf32, #tpu.memory_space<vmem>>, vector<2x32xf32>
    tpu.vector_store %arg4[%c0_5, %c0_6], %6 {strides = array<i32>} : memref<2x32xf32, #tpu.memory_space<vmem>>, vector<2x32xf32>,
    %c0_i32_7 = arith.constant 0 : i32
    %8 = arith.cmpi eq, %arg1, %c0_i32_7 : i32
    %9 = arith.extui %8 : i1 to i32
    %c0_i32_8 = arith.constant 0 : i32
    %10 = arith.cmpi ne, %9, %c0_i32_8 : i32
    scf.if %10 {
      %c0_9 = arith.constant 0 : index
      %c0_10 = arith.constant 0 : index
      %11 = vector.load %arg4[%c0_9, %c0_10] : memref<2x32xf32, #tpu.memory_space<vmem>>, vector<2x32xf32>
      %c0_11 = arith.constant 0 : index
      %c0_12 = arith.constant 0 : index
      %12 = vector.load %arg3[%c0_11, %c0_12] : memref<2x32xf32, #tpu.memory_space<vmem>>, vector<2x32xf32>
      tpu.vector_store %arg3[%c0_11, %c0_12], %11 {strides = array<i32>} : memref<2x32xf32, #tpu.memory_space<vmem>>, vector<2x32xf32>,
    } else {
    }
    return
  }
  func.func @transform_0(%arg0: i32, %arg1: i32) -> (i32, i32, i32) {
    %c0_i32 = arith.constant 0 : i32
    %c0_i32_0 = arith.constant 0 : i32
    return %arg1, %arg0, %c0_i32 : i32, i32, i32
  }
  func.func @transform_1(%arg0: i32, %arg1: i32) -> (i32, i32) {
    %c0_i32 = arith.constant 0 : i32
    %c0_i32_0 = arith.constant 0 : i32
    return %arg0, %c0_i32 : i32, i32
  }
}

</mosaic_0001>

<bundles_post_ra>
// kernel: tpu_custom_call.1
= control target key start
LH: loop header
LB: loop body
LE: loop exit
PB: predicated region body
PF: predicated region fallthrough
CT: control target
= control target key end

     0   :  { %6 = vsyncpa [#allocation4], 0  ;;  %s179_s0 = inlined_call_operand.hbm [shape: f32[8,2,32], index: 0, kind: input, shape index: {}]   ;;  %s180_s1 = inlined_call_operand.hbm [shape: f32[2,32], index: 1, kind: output, shape index: {}]  }
   0x1   :  { %7 = vsyncpa [#allocation5], 0  ;;  %s129_s6 = smov [#allocation3]   ;;  %s81_s10 = scalar_lea.hbm %s179_s0, 256 }
   0x2   :  { %s13_s7 = sshll.u32 %s129_s6, 4  ;;  %p82_p0 = scmp.ne.s32.totalorder %s179_s0, %s81_s10  ;;  %s14_s7 = int_to_ptr.vmem [resolvable:$true] %s13_s7 }
   0x3   :  { %p85_p1 = scmp.lt.u32.totalorder %s81_s10, %s179_s0 }
   0x5   :  { %p87_p2 = pnand %p85_p1, %p82_p0 }
   0x7   :  { %90 = shalt.err (!%p87_p2)
}
   0x8   :  { %s91_s15 = scalar_lea.vmem %s14_s7, 256  ;;  %p96_p4 = scmp.lt.s32.totalorder %s14_s7, %s14_s7 }
   0x9   :  { %p92_p3 = scmp.ne.s32.totalorder %s14_s7, %s91_s15  ;;  %p97_p5 = scmp.lt.s32.totalorder %s91_s15, %s91_s15 }
   0xb   :  { %p98_p6 = por %p97_p5, %p96_p4 }
   0xd   :  { %p99_p7 = pnand %p98_p6, %p92_p3 }
   0xf   :  { %102 = shalt.err (!%p99_p7)
}
  0x10   :  { %s130_s16 = smov 32   ;;  %s131_s17 = smov 2  }
  0x11   :  { %19 = dma.hbm_to_vmem [thread:$0]  %s179_s0, 256, %s14_s7, [#allocation4], %s130_s16, %s130_s16, %s131_s17  }
  0x12   :  { %125 = dma.done.wait [#allocation4], 256  }
  0x13   :  { %126 = vsyncadd [#allocation4], 4294967040  ;;  %vm27_vm0 = vcmask 254976   ;;  %v132_v0 = vmov 0.0   ;;  %v29_v1 = vld [vmem:[#allocation3] sm:$0x3] }
  0x14   :  { %28 = vst.msk [vmem:[#allocation2] sm:$0x3] %vm27_vm0, %v132_v0  ;;  %v30_v2 = vld [vmem:[#allocation3 + $0x2] sm:$0x3]  ;;  %v31_v3 = vld [vmem:[#allocation3 + $0x4] sm:$0x3] }
  0x15   :  { %v32_v4 = vld [vmem:[#allocation3 + $0x6] sm:$0x3]  ;;  %v39_v5 = vsel %vm27_vm0, %v29_v1, 0.0  ;;  %v40_v6 = vsel %vm27_vm0, %v30_v2, 0.0  ;;  %v42_v7 = vsel %vm27_vm0, %v31_v3, 0.0  ;;  %s133_s0 = smov [#allocation6]  }
  0x16   :  { %v33_v8 = vld [vmem:[#allocation3 + $0x8] sm:$0x3]  ;;  %v41_v9 = vadd.f32 %v40_v6, %v39_v5  ;;  %v44_v10 = vsel %vm27_vm0, %v32_v4, 0.0  ;;  %v34_v11 = vld [vmem:[#allocation3 + $0xa] sm:$0x3]  ;;  %s67_s20 = sshll.u32 %s133_s0, 4  ;;  %s68_s20 = int_to_ptr.vmem [resolvable:$true] %s67_s20 }
  0x17   :  { %v46_v13 = vsel %vm27_vm0, %v33_v8, 0.0  ;;  %v35_v14 = vld [vmem:[#allocation3 + $0xc] sm:$0x3]  ;;  %v48_v16 = vsel %vm27_vm0, %v34_v11, 0.0  ;;  %v36_v17 = vld [vmem:[#allocation3 + $0xe] sm:$0x3]  ;;  %p108_p9 = scmp.lt.s32.totalorder %s68_s20, %s68_s20 }
  0x18   :  { %v43_v12 = vadd.f32 %v42_v7, %v41_v9  ;;  %v50_v19 = vsel %vm27_vm0, %v35_v14, 0.0  ;;  %v52_v21 = vsel %vm27_vm0, %v36_v17, 0.0  ;;  %s103_s21 = scalar_lea.vmem %s68_s20, 32 }
  0x19   :  { %p104_p8 = scmp.ne.s32.totalorder %s68_s20, %s103_s21  ;;  %p109_p10 = scmp.lt.s32.totalorder %s103_s21, %s103_s21 }
  0x1a   :  { %v45_v15 = vadd.f32 %v44_v10, %v43_v12 }
  0x1b   :  { %v37_v23 = vld [vmem:[#allocation2] sm:$0x3]  ;;  %p110_p11 = por %p109_p10, %p108_p9 }
  0x1c   :  { %v47_v18 = vadd.f32 %v46_v13, %v45_v15 }
  0x1d   :  { %p111_p12 = pnand %p110_p11, %p104_p8 }
  0x1e   :  { %v49_v20 = vadd.f32 %v48_v16, %v47_v18 }
  0x20   :  { %v51_v22 = vadd.f32 %v50_v19, %v49_v20 }
  0x22   :  { %v53_v24 = vadd.f32 %v52_v21, %v51_v22 }
  0x24   :  { %v54_v25 = vadd.f32 %v53_v24, %v37_v23 }
  0x26   :  { %55 = vst.msk [vmem:[#allocation2] sm:$0x3] %vm27_vm0, %v54_v25 }
  0x2d   :  { %v59_v26 = vld [vmem:[#allocation2] sm:$0x3] }
  0x2e   :  { %60 = vst.msk [vmem:[#allocation6] sm:$0x3] %vm27_vm0, %v59_v26 }
  0x2f   :  { %114 = shalt.err (!%p111_p12)
}
  0x30   :  { %s115_s24 = scalar_lea.hbm %s180_s1, 32 }
  0x31   :  { %p116_p13 = scmp.ne.s32.totalorder %s180_s1, %s115_s24  ;;  %p119_p0 = scmp.lt.u32.totalorder %s115_s24, %s180_s1 }
  0x33   :  { %p121_p1 = pnand %p119_p0, %p116_p13 }
  0x35   :  { %124 = shalt.err (!%p121_p1)
}
  0x36   :  { %70 = dma.vmem_to_hbm [thread:$0]  %s68_s20, 32, %s180_s1, [#allocation5]  }
  0x37   :  { %127 = dma.done.wait [#allocation5], 32  }
  0x38   :  { %128 = vsyncadd [#allocation5], 4294967264 }
  0x39   :  { %74 = vsyncpa [#allocation4], 1 }
  0x3a   :  { %75 = vsyncpa [#allocation5], 1 }

</bundles_post_ra>
